<compile_context>
chip_gen: v7x
topology: tpu7x:2x2x1
jax: 0.10.0
libtpu: 0.0.40
codegen_flags: <defaults>
</compile_context>

<pallas_src>
import jax
import jax.numpy as jnp
from jax import lax
from jax.experimental import pallas as pl
from jax.experimental.pallas import tpu as pltpu


def _round_up(x, m):
    return ((x + m - 1) // m) * m


def cbow_logits_kernel(idx_ref, emb_hbm, w_ref, b_ref, logits_ref, lse_ref,
                       rows_scr, v_scr, m_scr, s_scr, sem):
    # idx_ref    : SMEM (C,) int32           -- context word indices
    # emb_hbm    : HBM  (V, E) f32           -- embedding table (stays in HBM)
    # w_ref      : VMEM (TILE_V, E) bf16     -- streamed weight tile (nn.Linear layout)
    # b_ref      : VMEM (1, TILE_V) f32      -- bias tile (padded entries ~ -inf)
    # logits_ref : VMEM (1, TILE_V) f32      -- unnormalized logits tile (output)
    # lse_ref    : VMEM (1, 1) f32           -- global logsumexp (output, last step)
    # scratch    : rows_scr (C_pad, E) f32, v_scr (1, E) f32,
    #              m_scr/s_scr (1, 1) f32, sem DMA((C_pad,))
    j = pl.program_id(0)
    C = idx_ref.shape[0]

    @pl.when(j == 0)
    def _gather_and_init():
        # Issue all C row-gather DMAs up front so they overlap each other and
        # the first weight-tile prefetch, then wait on all of them.
        for i in range(C):
            pltpu.make_async_copy(
                emb_hbm.at[pl.ds(idx_ref[i], 1), :],
                rows_scr.at[pl.ds(i, 1), :],
                sem.at[i],
            ).start()
        for i in range(C):
            pltpu.make_async_copy(
                emb_hbm.at[pl.ds(idx_ref[i], 1), :],
                rows_scr.at[pl.ds(i, 1), :],
                sem.at[i],
            ).wait()
        # torch.sum(v, dim=0).view(1, -1)
        v_scr[...] = jnp.sum(rows_scr[0:C, :], axis=0, keepdims=True)
        m_scr[...] = jnp.full_like(m_scr, -jnp.inf)
        s_scr[...] = jnp.zeros_like(s_scr)

    # h_tile = v @ W_tile.T + b_tile on the MXU.  The weight is streamed from
    # HBM as bf16 (bandwidth) and upcast in-register; accumulation is f32.
    w_tile = w_ref[...].astype(jnp.float32)
    h = lax.dot_general(
        v_scr[...], w_tile,
        dimension_numbers=(((1,), (1,)), ((), ())),   # contract over E
        preferred_element_type=jnp.float32,
    ) + b_ref[...]
    logits_ref[...] = h

    # Online running max / sum-exp -> global log-softmax normalizer.
    m_prev = m_scr[...]
    m_new = jnp.maximum(m_prev, jnp.max(h, axis=1, keepdims=True))
    s_scr[...] = (s_scr[...] * jnp.exp(m_prev - m_new)
                  + jnp.sum(jnp.exp(h - m_new), axis=1, keepdims=True))
    m_scr[...] = m_new

    @pl.when(j == pl.num_programs(0) - 1)
    def _finalize():
        lse_ref[...] = m_scr[...] + jnp.log(s_scr[...])


def cbow_normalize_kernel(logits_ref, lse_ref, out_ref):
    # logits_ref : VMEM (1, TILE_V) f32
    # lse_ref    : SMEM (1, 1) f32
    # out_ref    : VMEM (1, TILE_V) f32
    out_ref[...] = logits_ref[...] - lse_ref[0, 0]


def prepare_cbow_params(linear_w, linear_b, tile_v):
    """One-time (outside hot path) padding + bf16 cast of the Linear params.

    linear_w: (V, E) f32 (nn.Linear layout), linear_b: (V,) f32.
    Returns W padded to (V_pad, E) bf16 and bias padded to (1, V_pad) f32 with
    ~-inf in the padded slots (so padded logits vanish in the softmax).
    """
    V, E = linear_w.shape
    V_pad = _round_up(V, tile_v)
    w_pad = jnp.zeros((V_pad, E), jnp.bfloat16).at[:V, :].set(
        linear_w.astype(jnp.bfloat16))
    b_pad = jnp.full((1, V_pad), -1e30, jnp.float32).at[0, :V].set(
        linear_b.astype(jnp.float32))
    return w_pad, b_pad


def cbow_forward(indices, emb_table, w_pad, b_pad, vocab_size, tile_v):
    """indices: (C,) int32; emb_table: (V, E) f32 (stays in HBM);
    w_pad: (V_pad, E) bf16; b_pad: (1, V_pad) f32. Returns (1, V) f32 log-probs."""
    V, E = emb_table.shape
    V_pad = w_pad.shape[0]
    assert V_pad % tile_v == 0 and b_pad.shape == (1, V_pad)
    n_tiles = V_pad // tile_v
    C = indices.shape[0]
    C_pad = _round_up(C, 8)

    # Pass 1: per-tile logits (lane-dense) + global logsumexp, streaming the
    # bf16 weight over a 1-D grid on V.  Axis is "arbitrary" because the online
    # logsumexp and the one-time gather are carried in scratch across steps.
    logits, lse = pl.pallas_call(
        cbow_logits_kernel,
        out_shape=(jax.ShapeDtypeStruct((1, V_pad), jnp.float32),
                   jax.ShapeDtypeStruct((1, 1), jnp.float32)),
        grid_spec=pltpu.PrefetchScalarGridSpec(
            num_scalar_prefetch=0,
            grid=(n_tiles,),
            in_specs=[
                pl.BlockSpec(memory_space=pltpu.MemorySpace.SMEM),  # indices
                pl.BlockSpec(memory_space=pl.ANY),                  # emb table (HBM)
                pl.BlockSpec((tile_v, E), lambda j: (j, 0)),        # weight tile
                pl.BlockSpec((1, tile_v), lambda j: (0, j)),        # bias tile
            ],
            out_specs=[
                pl.BlockSpec((1, tile_v), lambda j: (0, j)),        # logits tile
                pl.BlockSpec((1, 1), lambda j: (0, 0)),             # logsumexp
            ],
            scratch_shapes=[
                pltpu.VMEM((C_pad, E), jnp.float32),   # gathered context rows
                pltpu.VMEM((1, E), jnp.float32),       # summed context vector
                pltpu.VMEM((1, 1), jnp.float32),       # running max
                pltpu.VMEM((1, 1), jnp.float32),       # running sum-exp
                pltpu.SemaphoreType.DMA((C_pad,)),
            ],
        ),
        compiler_params=pltpu.CompilerParams(
            dimension_semantics=("arbitrary",)),
    )(indices, emb_table, w_pad, b_pad)

    # Pass 2: normalize.  Independent per vocab tile -> "parallel" so v7x's two
    # TensorCores split the sweep.
    log_probs_pad = pl.pallas_call(
        cbow_normalize_kernel,
        out_shape=jax.ShapeDtypeStruct((1, V_pad), jnp.float32),
        grid=(n_tiles,),
        in_specs=[
            pl.BlockSpec((1, tile_v), lambda j: (0, j)),
            pl.BlockSpec(memory_space=pltpu.MemorySpace.SMEM),      # lse scalar
        ],
        out_specs=pl.BlockSpec((1, tile_v), lambda j: (0, j)),
        compiler_params=pltpu.CompilerParams(
            dimension_semantics=("parallel",)),
    )(logits, lse)

    return log_probs_pad[:, :vocab_size]


def cbow_reference(indices, emb_table, w_bf16, linear_b):
    """Pure-JAX reference using the same bf16-rounded weights as the kernel."""
    v = jnp.sum(emb_table[indices], axis=0, keepdims=True)       # (1, E) f32
    h = v @ w_bf16.astype(jnp.float32).T + linear_b.reshape(1, -1)
    return jax.nn.log_softmax(h, axis=1)


if __name__ == "__main__":
    vocab_size = 500       # not a multiple of 128 -> exercises V padding/masking
    embedding_size = 32
    context_size = 8       # e.g. 4 words before + 4 words after the target
    TILE_V = 128           # demo tile; for real vocabs pick ~1k-8k (VMEM budget)

    key = jax.random.PRNGKey(0)
    k_emb, k_w, k_b, k_idx = jax.random.split(key, 4)

    # Deterministic synthetic parameters (shapes follow nn.Embedding / nn.Linear).
    emb_table = jax.random.normal(k_emb, (vocab_size, embedding_size), jnp.float32)
    linear_w = jax.random.normal(k_w, (vocab_size, embedding_size), jnp.float32) * 0.1
    linear_b = jax.random.normal(k_b, (vocab_size,), jnp.float32) * 0.1

    # Context word indices (the module's forward input `x`).
    x = jax.random.randint(k_idx, (context_size,), 0, vocab_size, jnp.int32)

    # One-time parameter preparation (padding + bf16 cast), outside the hot path.
    w_pad, b_pad = prepare_cbow_params(linear_w, linear_b, TILE_V)

    out = cbow_forward(x, emb_table, w_pad, b_pad, vocab_size, TILE_V)
    out = jax.block_until_ready(out)

    ref = cbow_reference(x, emb_table, w_pad[:vocab_size], linear_b)
    assert out.shape == (1, vocab_size)
    assert jnp.allclose(out, ref, atol=1e-4, rtol=1e-4), \
        float(jnp.max(jnp.abs(out - ref)))

    print("KERNEL_OK")
</pallas_src>

<mosaic_0001>
module attributes {stable_mosaic.version = 11 : i64} {
  func.func @cbow_logits_kernel(%arg0: i32, %arg1: memref<8xi32, #tpu.memory_space<smem>>, %arg2: memref<500x32xf32, #tpu.memory_space<any>>, %arg3: memref<128x32xbf16, #tpu.memory_space<vmem>>, %arg4: memref<1x128xf32, #tpu.memory_space<vmem>>, %arg5: memref<1x128xf32, #tpu.memory_space<vmem>>, %arg6: memref<1x1xf32, #tpu.memory_space<vmem>>, %arg7: memref<8x32xf32, #tpu.memory_space<vmem>>, %arg8: memref<1x32xf32, #tpu.memory_space<vmem>>, %arg9: memref<1x1xf32, #tpu.memory_space<vmem>>, %arg10: memref<1x1xf32, #tpu.memory_space<vmem>>, %arg11: memref<8x!tpu.dma_semaphore, #tpu.memory_space<semaphore_mem>>) attributes {dimension_semantics = [#tpu.dimension_semantics<arbitrary>], iteration_bounds = array<i64: 4>, scalar_prefetch = 0 : i64, scratch_operands = 5 : i64, tpu.core_type = #tpu.core_type<tc>, window_params = [{transform_indices = @transform_0, window_bounds = array<i64: 8>}, {}, {transform_indices = @transform_2, window_bounds = array<i64: 128, 32>}, {transform_indices = @transform_3, window_bounds = array<i64: 1, 128>}, {transform_indices = @transform_4, window_bounds = array<i64: 1, 128>}, {pipeline_mode = #tpu.pipeline_mode<synchronous>, transform_indices = @transform_5, window_bounds = array<i64: 1, 1>}]} {
    %c0_i32 = arith.constant 0 : i32
    %0 = arith.cmpi eq, %arg0, %c0_i32 : i32
    %1 = arith.extui %0 : i1 to i32
    %c0_i32_0 = arith.constant 0 : i32
    %2 = arith.cmpi ne, %1, %c0_i32_0 : i32
    scf.if %2 {
      %c0_19 = arith.constant 0 : index
      %29 = memref.load %arg1[%c0_19] : memref<8xi32, #tpu.memory_space<smem>>
      %c0_i32_20 = arith.constant 0 : i32
      %c0_i32_21 = arith.constant 0 : i32
      %30 = tpu.memref_slice %arg2[%29, %c0_i32_21] : memref<500x32xf32, #tpu.memory_space<any>> -> memref<1x32xf32, #tpu.memory_space<any>>
      %c0_i32_22 = arith.constant 0 : i32
      %c0_i32_23 = arith.constant 0 : i32
      %31 = tpu.memref_slice %arg7[%c0_i32_22, %c0_i32_23] : memref<8x32xf32, #tpu.memory_space<vmem>> -> memref<1x32xf32, #tpu.memory_space<vmem>>
      %32 = tpu.memref_slice %arg11[%c0_i32_20] : memref<8x!tpu.dma_semaphore, #tpu.memory_space<semaphore_mem>> -> memref<1x!tpu.dma_semaphore, #tpu.memory_space<semaphore_mem>>
      %33 = tpu.memref_squeeze %32 : memref<1x!tpu.dma_semaphore, #tpu.memory_space<semaphore_mem>> -> memref<!tpu.dma_semaphore, #tpu.memory_space<semaphore_mem>>
      tpu.enqueue_dma source(%30 : memref<1x32xf32, #tpu.memory_space<any>>) target(%31 : memref<1x32xf32, #tpu.memory_space<vmem>>) target_semaphore(%33 : memref<!tpu.dma_semaphore, #tpu.memory_space<semaphore_mem>>)
      %c1 = arith.constant 1 : index
      %34 = memref.load %arg1[%c1] : memref<8xi32, #tpu.memory_space<smem>>
      %c1_i32 = arith.constant 1 : i32
      %c0_i32_24 = arith.constant 0 : i32
      %35 = tpu.memref_slice %arg2[%34, %c0_i32_24] : memref<500x32xf32, #tpu.memory_space<any>> -> memref<1x32xf32, #tpu.memory_space<any>>
      %c1_i32_25 = arith.constant 1 : i32
      %c0_i32_26 = arith.constant 0 : i32
      %36 = tpu.memref_slice %arg7[%c1_i32_25, %c0_i32_26] : memref<8x32xf32, #tpu.memory_space<vmem>> -> memref<1x32xf32, #tpu.memory_space<vmem>>
      %37 = tpu.memref_slice %arg11[%c1_i32] : memref<8x!tpu.dma_semaphore, #tpu.memory_space<semaphore_mem>> -> memref<1x!tpu.dma_semaphore, #tpu.memory_space<semaphore_mem>>
      %38 = tpu.memref_squeeze %37 : memref<1x!tpu.dma_semaphore, #tpu.memory_space<semaphore_mem>> -> memref<!tpu.dma_semaphore, #tpu.memory_space<semaphore_mem>>
      tpu.enqueue_dma source(%35 : memref<1x32xf32, #tpu.memory_space<any>>) target(%36 : memref<1x32xf32, #tpu.memory_space<vmem>>) target_semaphore(%38 : memref<!tpu.dma_semaphore, #tpu.memory_space<semaphore_mem>>)
      %c2 = arith.constant 2 : index
      %39 = memref.load %arg1[%c2] : memref<8xi32, #tpu.memory_space<smem>>
      %c2_i32 = arith.constant 2 : i32
      %c0_i32_27 = arith.constant 0 : i32
      %40 = tpu.memref_slice %arg2[%39, %c0_i32_27] : memref<500x32xf32, #tpu.memory_space<any>> -> memref<1x32xf32, #tpu.memory_space<any>>
      %c2_i32_28 = arith.constant 2 : i32
      %c0_i32_29 = arith.constant 0 : i32
      %41 = tpu.memref_slice %arg7[%c2_i32_28, %c0_i32_29] : memref<8x32xf32, #tpu.memory_space<vmem>> -> memref<1x32xf32, #tpu.memory_space<vmem>>
      %42 = tpu.memref_slice %arg11[%c2_i32] : memref<8x!tpu.dma_semaphore, #tpu.memory_space<semaphore_mem>> -> memref<1x!tpu.dma_semaphore, #tpu.memory_space<semaphore_mem>>
      %43 = tpu.memref_squeeze %42 : memref<1x!tpu.dma_semaphore, #tpu.memory_space<semaphore_mem>> -> memref<!tpu.dma_semaphore, #tpu.memory_space<semaphore_mem>>
      tpu.enqueue_dma source(%40 : memref<1x32xf32, #tpu.memory_space<any>>) target(%41 : memref<1x32xf32, #tpu.memory_space<vmem>>) target_semaphore(%43 : memref<!tpu.dma_semaphore, #tpu.memory_space<semaphore_mem>>)
      %c3 = arith.constant 3 : index
      %44 = memref.load %arg1[%c3] : memref<8xi32, #tpu.memory_space<smem>>
      %c3_i32_30 = arith.constant 3 : i32
      %c0_i32_31 = arith.constant 0 : i32
      %45 = tpu.memref_slice %arg2[%44, %c0_i32_31] : memref<500x32xf32, #tpu.memory_space<any>> -> memref<1x32xf32, #tpu.memory_space<any>>
      %c3_i32_32 = arith.constant 3 : i32
      %c0_i32_33 = arith.constant 0 : i32
      %46 = tpu.memref_slice %arg7[%c3_i32_32, %c0_i32_33] : memref<8x32xf32, #tpu.memory_space<vmem>> -> memref<1x32xf32, #tpu.memory_space<vmem>>
      %47 = tpu.memref_slice %arg11[%c3_i32_30] : memref<8x!tpu.dma_semaphore, #tpu.memory_space<semaphore_mem>> -> memref<1x!tpu.dma_semaphore, #tpu.memory_space<semaphore_mem>>
      %48 = tpu.memref_squeeze %47 : memref<1x!tpu.dma_semaphore, #tpu.memory_space<semaphore_mem>> -> memref<!tpu.dma_semaphore, #tpu.memory_space<semaphore_mem>>
      tpu.enqueue_dma source(%45 : memref<1x32xf32, #tpu.memory_space<any>>) target(%46 : memref<1x32xf32, #tpu.memory_space<vmem>>) target_semaphore(%48 : memref<!tpu.dma_semaphore, #tpu.memory_space<semaphore_mem>>)
      %c4 = arith.constant 4 : index
      %49 = memref.load %arg1[%c4] : memref<8xi32, #tpu.memory_space<smem>>
      %c4_i32 = arith.constant 4 : i32
      %c0_i32_34 = arith.constant 0 : i32
      %50 = tpu.memref_slice %arg2[%49, %c0_i32_34] : memref<500x32xf32, #tpu.memory_space<any>> -> memref<1x32xf32, #tpu.memory_space<any>>
      %c4_i32_35 = arith.constant 4 : i32
      %c0_i32_36 = arith.constant 0 : i32
      %51 = tpu.memref_slice %arg7[%c4_i32_35, %c0_i32_36] : memref<8x32xf32, #tpu.memory_space<vmem>> -> memref<1x32xf32, #tpu.memory_space<vmem>>
      %52 = tpu.memref_slice %arg11[%c4_i32] : memref<8x!tpu.dma_semaphore, #tpu.memory_space<semaphore_mem>> -> memref<1x!tpu.dma_semaphore, #tpu.memory_space<semaphore_mem>>
      %53 = tpu.memref_squeeze %52 : memref<1x!tpu.dma_semaphore, #tpu.memory_space<semaphore_mem>> -> memref<!tpu.dma_semaphore, #tpu.memory_space<semaphore_mem>>
      tpu.enqueue_dma source(%50 : memref<1x32xf32, #tpu.memory_space<any>>) target(%51 : memref<1x32xf32, #tpu.memory_space<vmem>>) target_semaphore(%53 : memref<!tpu.dma_semaphore, #tpu.memory_space<semaphore_mem>>)
      %c5 = arith.constant 5 : index
      %54 = memref.load %arg1[%c5] : memref<8xi32, #tpu.memory_space<smem>>
      %c5_i32 = arith.constant 5 : i32
      %c0_i32_37 = arith.constant 0 : i32
      %55 = tpu.memref_slice %arg2[%54, %c0_i32_37] : memref<500x32xf32, #tpu.memory_space<any>> -> memref<1x32xf32, #tpu.memory_space<any>>
      %c5_i32_38 = arith.constant 5 : i32
      %c0_i32_39 = arith.constant 0 : i32
      %56 = tpu.memref_slice %arg7[%c5_i32_38, %c0_i32_39] : memref<8x32xf32, #tpu.memory_space<vmem>> -> memref<1x32xf32, #tpu.memory_space<vmem>>
      %57 = tpu.memref_slice %arg11[%c5_i32] : memref<8x!tpu.dma_semaphore, #tpu.memory_space<semaphore_mem>> -> memref<1x!tpu.dma_semaphore, #tpu.memory_space<semaphore_mem>>
      %58 = tpu.memref_squeeze %57 : memref<1x!tpu.dma_semaphore, #tpu.memory_space<semaphore_mem>> -> memref<!tpu.dma_semaphore, #tpu.memory_space<semaphore_mem>>
      tpu.enqueue_dma source(%55 : memref<1x32xf32, #tpu.memory_space<any>>) target(%56 : memref<1x32xf32, #tpu.memory_space<vmem>>) target_semaphore(%58 : memref<!tpu.dma_semaphore, #tpu.memory_space<semaphore_mem>>)
      %c6 = arith.constant 6 : index
      %59 = memref.load %arg1[%c6] : memref<8xi32, #tpu.memory_space<smem>>
      %c6_i32 = arith.constant 6 : i32
      %c0_i32_40 = arith.constant 0 : i32
      %60 = tpu.memref_slice %arg2[%59, %c0_i32_40] : memref<500x32xf32, #tpu.memory_space<any>> -> memref<1x32xf32, #tpu.memory_space<any>>
      %c6_i32_41 = arith.constant 6 : i32
      %c0_i32_42 = arith.constant 0 : i32
      %61 = tpu.memref_slice %arg7[%c6_i32_41, %c0_i32_42] : memref<8x32xf32, #tpu.memory_space<vmem>> -> memref<1x32xf32, #tpu.memory_space<vmem>>
      %62 = tpu.memref_slice %arg11[%c6_i32] : memref<8x!tpu.dma_semaphore, #tpu.memory_space<semaphore_mem>> -> memref<1x!tpu.dma_semaphore, #tpu.memory_space<semaphore_mem>>
      %63 = tpu.memref_squeeze %62 : memref<1x!tpu.dma_semaphore, #tpu.memory_space<semaphore_mem>> -> memref<!tpu.dma_semaphore, #tpu.memory_space<semaphore_mem>>
      tpu.enqueue_dma source(%60 : memref<1x32xf32, #tpu.memory_space<any>>) target(%61 : memref<1x32xf32, #tpu.memory_space<vmem>>) target_semaphore(%63 : memref<!tpu.dma_semaphore, #tpu.memory_space<semaphore_mem>>)
      %c7 = arith.constant 7 : index
      %64 = memref.load %arg1[%c7] : memref<8xi32, #tpu.memory_space<smem>>
      %c7_i32 = arith.constant 7 : i32
      %c0_i32_43 = arith.constant 0 : i32
      %65 = tpu.memref_slice %arg2[%64, %c0_i32_43] : memref<500x32xf32, #tpu.memory_space<any>> -> memref<1x32xf32, #tpu.memory_space<any>>
      %c7_i32_44 = arith.constant 7 : i32
      %c0_i32_45 = arith.constant 0 : i32
      %66 = tpu.memref_slice %arg7[%c7_i32_44, %c0_i32_45] : memref<8x32xf32, #tpu.memory_space<vmem>> -> memref<1x32xf32, #tpu.memory_space<vmem>>
      %67 = tpu.memref_slice %arg11[%c7_i32] : memref<8x!tpu.dma_semaphore, #tpu.memory_space<semaphore_mem>> -> memref<1x!tpu.dma_semaphore, #tpu.memory_space<semaphore_mem>>
      %68 = tpu.memref_squeeze %67 : memref<1x!tpu.dma_semaphore, #tpu.memory_space<semaphore_mem>> -> memref<!tpu.dma_semaphore, #tpu.memory_space<semaphore_mem>>
      tpu.enqueue_dma source(%65 : memref<1x32xf32, #tpu.memory_space<any>>) target(%66 : memref<1x32xf32, #tpu.memory_space<vmem>>) target_semaphore(%68 : memref<!tpu.dma_semaphore, #tpu.memory_space<semaphore_mem>>)
      %c0_46 = arith.constant 0 : index
      %69 = memref.load %arg1[%c0_46] : memref<8xi32, #tpu.memory_space<smem>>
      %c0_i32_47 = arith.constant 0 : i32
      %c0_i32_48 = arith.constant 0 : i32
      %70 = tpu.memref_slice %arg2[%69, %c0_i32_48] : memref<500x32xf32, #tpu.memory_space<any>> -> memref<1x32xf32, #tpu.memory_space<any>>
      %c0_i32_49 = arith.constant 0 : i32
      %c0_i32_50 = arith.constant 0 : i32
      %71 = tpu.memref_slice %arg7[%c0_i32_49, %c0_i32_50] : memref<8x32xf32, #tpu.memory_space<vmem>> -> memref<1x32xf32, #tpu.memory_space<vmem>>
      %72 = tpu.memref_slice %arg11[%c0_i32_47] : memref<8x!tpu.dma_semaphore, #tpu.memory_space<semaphore_mem>> -> memref<1x!tpu.dma_semaphore, #tpu.memory_space<semaphore_mem>>
      %73 = tpu.memref_squeeze %72 : memref<1x!tpu.dma_semaphore, #tpu.memory_space<semaphore_mem>> -> memref<!tpu.dma_semaphore, #tpu.memory_space<semaphore_mem>>
      tpu.wait_dma2 semaphore(%73 : memref<!tpu.dma_semaphore, #tpu.memory_space<semaphore_mem>>) src(%70 : memref<1x32xf32, #tpu.memory_space<any>>) dst(%71 : memref<1x32xf32, #tpu.memory_space<vmem>>)
      %c1_51 = arith.constant 1 : index
      %74 = memref.load %arg1[%c1_51] : memref<8xi32, #tpu.memory_space<smem>>
      %c1_i32_52 = arith.constant 1 : i32
      %c0_i32_53 = arith.constant 0 : i32
      %75 = tpu.memref_slice %arg2[%74, %c0_i32_53] : memref<500x32xf32, #tpu.memory_space<any>> -> memref<1x32xf32, #tpu.memory_space<any>>
      %c1_i32_54 = arith.constant 1 : i32
      %c0_i32_55 = arith.constant 0 : i32
      %76 = tpu.memref_slice %arg7[%c1_i32_54, %c0_i32_55] : memref<8x32xf32, #tpu.memory_space<vmem>> -> memref<1x32xf32, #tpu.memory_space<vmem>>
      %77 = tpu.memref_slice %arg11[%c1_i32_52] : memref<8x!tpu.dma_semaphore, #tpu.memory_space<semaphore_mem>> -> memref<1x!tpu.dma_semaphore, #tpu.memory_space<semaphore_mem>>
      %78 = tpu.memref_squeeze %77 : memref<1x!tpu.dma_semaphore, #tpu.memory_space<semaphore_mem>> -> memref<!tpu.dma_semaphore, #tpu.memory_space<semaphore_mem>>
      tpu.wait_dma2 semaphore(%78 : memref<!tpu.dma_semaphore, #tpu.memory_space<semaphore_mem>>) src(%75 : memref<1x32xf32, #tpu.memory_space<any>>) dst(%76 : memref<1x32xf32, #tpu.memory_space<vmem>>)
      %c2_56 = arith.constant 2 : index
      %79 = memref.load %arg1[%c2_56] : memref<8xi32, #tpu.memory_space<smem>>
      %c2_i32_57 = arith.constant 2 : i32
      %c0_i32_58 = arith.constant 0 : i32
      %80 = tpu.memref_slice %arg2[%79, %c0_i32_58] : memref<500x32xf32, #tpu.memory_space<any>> -> memref<1x32xf32, #tpu.memory_space<any>>
      %c2_i32_59 = arith.constant 2 : i32
      %c0_i32_60 = arith.constant 0 : i32
      %81 = tpu.memref_slice %arg7[%c2_i32_59, %c0_i32_60] : memref<8x32xf32, #tpu.memory_space<vmem>> -> memref<1x32xf32, #tpu.memory_space<vmem>>
      %82 = tpu.memref_slice %arg11[%c2_i32_57] : memref<8x!tpu.dma_semaphore, #tpu.memory_space<semaphore_mem>> -> memref<1x!tpu.dma_semaphore, #tpu.memory_space<semaphore_mem>>
      %83 = tpu.memref_squeeze %82 : memref<1x!tpu.dma_semaphore, #tpu.memory_space<semaphore_mem>> -> memref<!tpu.dma_semaphore, #tpu.memory_space<semaphore_mem>>
      tpu.wait_dma2 semaphore(%83 : memref<!tpu.dma_semaphore, #tpu.memory_space<semaphore_mem>>) src(%80 : memref<1x32xf32, #tpu.memory_space<any>>) dst(%81 : memref<1x32xf32, #tpu.memory_space<vmem>>)
      %c3_61 = arith.constant 3 : index
      %84 = memref.load %arg1[%c3_61] : memref<8xi32, #tpu.memory_space<smem>>
      %c3_i32_62 = arith.constant 3 : i32
      %c0_i32_63 = arith.constant 0 : i32
      %85 = tpu.memref_slice %arg2[%84, %c0_i32_63] : memref<500x32xf32, #tpu.memory_space<any>> -> memref<1x32xf32, #tpu.memory_space<any>>
      %c3_i32_64 = arith.constant 3 : i32
      %c0_i32_65 = arith.constant 0 : i32
      %86 = tpu.memref_slice %arg7[%c3_i32_64, %c0_i32_65] : memref<8x32xf32, #tpu.memory_space<vmem>> -> memref<1x32xf32, #tpu.memory_space<vmem>>
      %87 = tpu.memref_slice %arg11[%c3_i32_62] : memref<8x!tpu.dma_semaphore, #tpu.memory_space<semaphore_mem>> -> memref<1x!tpu.dma_semaphore, #tpu.memory_space<semaphore_mem>>
      %88 = tpu.memref_squeeze %87 : memref<1x!tpu.dma_semaphore, #tpu.memory_space<semaphore_mem>> -> memref<!tpu.dma_semaphore, #tpu.memory_space<semaphore_mem>>
      tpu.wait_dma2 semaphore(%88 : memref<!tpu.dma_semaphore, #tpu.memory_space<semaphore_mem>>) src(%85 : memref<1x32xf32, #tpu.memory_space<any>>) dst(%86 : memref<1x32xf32, #tpu.memory_space<vmem>>)
      %c4_66 = arith.constant 4 : index
      %89 = memref.load %arg1[%c4_66] : memref<8xi32, #tpu.memory_space<smem>>
      %c4_i32_67 = arith.constant 4 : i32
      %c0_i32_68 = arith.constant 0 : i32
      %90 = tpu.memref_slice %arg2[%89, %c0_i32_68] : memref<500x32xf32, #tpu.memory_space<any>> -> memref<1x32xf32, #tpu.memory_space<any>>
      %c4_i32_69 = arith.constant 4 : i32
      %c0_i32_70 = arith.constant 0 : i32
      %91 = tpu.memref_slice %arg7[%c4_i32_69, %c0_i32_70] : memref<8x32xf32, #tpu.memory_space<vmem>> -> memref<1x32xf32, #tpu.memory_space<vmem>>
      %92 = tpu.memref_slice %arg11[%c4_i32_67] : memref<8x!tpu.dma_semaphore, #tpu.memory_space<semaphore_mem>> -> memref<1x!tpu.dma_semaphore, #tpu.memory_space<semaphore_mem>>
      %93 = tpu.memref_squeeze %92 : memref<1x!tpu.dma_semaphore, #tpu.memory_space<semaphore_mem>> -> memref<!tpu.dma_semaphore, #tpu.memory_space<semaphore_mem>>
      tpu.wait_dma2 semaphore(%93 : memref<!tpu.dma_semaphore, #tpu.memory_space<semaphore_mem>>) src(%90 : memref<1x32xf32, #tpu.memory_space<any>>) dst(%91 : memref<1x32xf32, #tpu.memory_space<vmem>>)
      %c5_71 = arith.constant 5 : index
      %94 = memref.load %arg1[%c5_71] : memref<8xi32, #tpu.memory_space<smem>>
      %c5_i32_72 = arith.constant 5 : i32
      %c0_i32_73 = arith.constant 0 : i32
      %95 = tpu.memref_slice %arg2[%94, %c0_i32_73] : memref<500x32xf32, #tpu.memory_space<any>> -> memref<1x32xf32, #tpu.memory_space<any>>
      %c5_i32_74 = arith.constant 5 : i32
      %c0_i32_75 = arith.constant 0 : i32
      %96 = tpu.memref_slice %arg7[%c5_i32_74, %c0_i32_75] : memref<8x32xf32, #tpu.memory_space<vmem>> -> memref<1x32xf32, #tpu.memory_space<vmem>>
      %97 = tpu.memref_slice %arg11[%c5_i32_72] : memref<8x!tpu.dma_semaphore, #tpu.memory_space<semaphore_mem>> -> memref<1x!tpu.dma_semaphore, #tpu.memory_space<semaphore_mem>>
      %98 = tpu.memref_squeeze %97 : memref<1x!tpu.dma_semaphore, #tpu.memory_space<semaphore_mem>> -> memref<!tpu.dma_semaphore, #tpu.memory_space<semaphore_mem>>
      tpu.wait_dma2 semaphore(%98 : memref<!tpu.dma_semaphore, #tpu.memory_space<semaphore_mem>>) src(%95 : memref<1x32xf32, #tpu.memory_space<any>>) dst(%96 : memref<1x32xf32, #tpu.memory_space<vmem>>)
      %c6_76 = arith.constant 6 : index
      %99 = memref.load %arg1[%c6_76] : memref<8xi32, #tpu.memory_space<smem>>
      %c6_i32_77 = arith.constant 6 : i32
      %c0_i32_78 = arith.constant 0 : i32
      %100 = tpu.memref_slice %arg2[%99, %c0_i32_78] : memref<500x32xf32, #tpu.memory_space<any>> -> memref<1x32xf32, #tpu.memory_space<any>>
      %c6_i32_79 = arith.constant 6 : i32
      %c0_i32_80 = arith.constant 0 : i32
      %101 = tpu.memref_slice %arg7[%c6_i32_79, %c0_i32_80] : memref<8x32xf32, #tpu.memory_space<vmem>> -> memref<1x32xf32, #tpu.memory_space<vmem>>
      %102 = tpu.memref_slice %arg11[%c6_i32_77] : memref<8x!tpu.dma_semaphore, #tpu.memory_space<semaphore_mem>> -> memref<1x!tpu.dma_semaphore, #tpu.memory_space<semaphore_mem>>
      %103 = tpu.memref_squeeze %102 : memref<1x!tpu.dma_semaphore, #tpu.memory_space<semaphore_mem>> -> memref<!tpu.dma_semaphore, #tpu.memory_space<semaphore_mem>>
      tpu.wait_dma2 semaphore(%103 : memref<!tpu.dma_semaphore, #tpu.memory_space<semaphore_mem>>) src(%100 : memref<1x32xf32, #tpu.memory_space<any>>) dst(%101 : memref<1x32xf32, #tpu.memory_space<vmem>>)
      %c7_81 = arith.constant 7 : index
      %104 = memref.load %arg1[%c7_81] : memref<8xi32, #tpu.memory_space<smem>>
      %c7_i32_82 = arith.constant 7 : i32
      %c0_i32_83 = arith.constant 0 : i32
      %105 = tpu.memref_slice %arg2[%104, %c0_i32_83] : memref<500x32xf32, #tpu.memory_space<any>> -> memref<1x32xf32, #tpu.memory_space<any>>
      %c7_i32_84 = arith.constant 7 : i32
      %c0_i32_85 = arith.constant 0 : i32
      %106 = tpu.memref_slice %arg7[%c7_i32_84, %c0_i32_85] : memref<8x32xf32, #tpu.memory_space<vmem>> -> memref<1x32xf32, #tpu.memory_space<vmem>>
      %107 = tpu.memref_slice %arg11[%c7_i32_82] : memref<8x!tpu.dma_semaphore, #tpu.memory_space<semaphore_mem>> -> memref<1x!tpu.dma_semaphore, #tpu.memory_space<semaphore_mem>>
      %108 = tpu.memref_squeeze %107 : memref<1x!tpu.dma_semaphore, #tpu.memory_space<semaphore_mem>> -> memref<!tpu.dma_semaphore, #tpu.memory_space<semaphore_mem>>
      tpu.wait_dma2 semaphore(%108 : memref<!tpu.dma_semaphore, #tpu.memory_space<semaphore_mem>>) src(%105 : memref<1x32xf32, #tpu.memory_space<any>>) dst(%106 : memref<1x32xf32, #tpu.memory_space<vmem>>)
      %c0_86 = arith.constant 0 : index
      %c0_87 = arith.constant 0 : index
      %109 = vector.load %arg7[%c0_86, %c0_87] : memref<8x32xf32, #tpu.memory_space<vmem>>, vector<8x32xf32>
      %cst_88 = arith.constant dense<0.000000e+00> : vector<32xf32>
      %110 = vector.multi_reduction <add>, %109, %cst_88 [0] : vector<8x32xf32> to vector<32xf32>
      %111 = vector.shape_cast %110 : vector<32xf32> to vector<1x32xf32>
      %c0_89 = arith.constant 0 : index
      %c0_90 = arith.constant 0 : index
      %112 = vector.load %arg8[%c0_89, %c0_90] : memref<1x32xf32, #tpu.memory_space<vmem>>, vector<1x32xf32>
      tpu.vector_store %arg8[%c0_89, %c0_90], %111 {strides = array<i32>} : memref<1x32xf32, #tpu.memory_space<vmem>>, vector<1x32xf32>,
      %cst_91 = arith.constant 0xFF800000 : f32
      %113 = vector.broadcast %cst_91 : f32 to vector<1x1xf32>
      %c0_92 = arith.constant 0 : index
      %c0_93 = arith.constant 0 : index
      %114 = vector.load %arg9[%c0_92, %c0_93] : memref<1x1xf32, #tpu.memory_space<vmem>>, vector<1x1xf32>
      tpu.vector_store %arg9[%c0_92, %c0_93], %113 {strides = array<i32>} : memref<1x1xf32, #tpu.memory_space<vmem>>, vector<1x1xf32>,
      %cst_94 = arith.constant 0.000000e+00 : f32
      %115 = vector.broadcast %cst_94 : f32 to vector<1x1xf32>
      %c0_95 = arith.constant 0 : index
      %c0_96 = arith.constant 0 : index
      %116 = vector.load %arg10[%c0_95, %c0_96] : memref<1x1xf32, #tpu.memory_space<vmem>>, vector<1x1xf32>
      tpu.vector_store %arg10[%c0_95, %c0_96], %115 {strides = array<i32>} : memref<1x1xf32, #tpu.memory_space<vmem>>, vector<1x1xf32>,
    } else {
    }
    %c0 = arith.constant 0 : index
    %c0_1 = arith.constant 0 : index
    %3 = vector.load %arg3[%c0, %c0_1] : memref<128x32xbf16, #tpu.memory_space<vmem>>, vector<128x32xbf16>
    %4 = arith.extf %3 : vector<128x32xbf16> to vector<128x32xf32>
    %c0_2 = arith.constant 0 : index
    %c0_3 = arith.constant 0 : index
    %5 = vector.load %arg8[%c0_2, %c0_3] : memref<1x32xf32, #tpu.memory_space<vmem>>, vector<1x32xf32>
    %cst = arith.constant dense<0.000000e+00> : vector<1x128xf32>
    %6 = tpu.matmul %5, %4, %cst {dimension_numbers = #tpu.dot_dimension_numbers<[1], [1], [0], [0], [0, 0, 1, 0], [], []>} : vector<1x32xf32>, vector<128x32xf32>, vector<1x128xf32> -> vector<1x128xf32>
    %c0_4 = arith.constant 0 : index
    %c0_5 = arith.constant 0 : index
    %7 = vector.load %arg4[%c0_4, %c0_5] : memref<1x128xf32, #tpu.memory_space<vmem>>, vector<1x128xf32>
    %8 = arith.addf %6, %7 : vector<1x128xf32>
    %c0_6 = arith.constant 0 : index
    %c0_7 = arith.constant 0 : index
    %9 = vector.load %arg5[%c0_6, %c0_7] : memref<1x128xf32, #tpu.memory_space<vmem>>, vector<1x128xf32>
    tpu.vector_store %arg5[%c0_6, %c0_7], %8 {strides = array<i32>} : memref<1x128xf32, #tpu.memory_space<vmem>>, vector<1x128xf32>,
    %c0_8 = arith.constant 0 : index
    %c0_9 = arith.constant 0 : index
    %10 = vector.load %arg9[%c0_8, %c0_9] : memref<1x1xf32, #tpu.memory_space<vmem>>, vector<1x1xf32>
    %cst_10 = arith.constant dense<0xFF800000> : vector<1xf32>
    %11 = vector.multi_reduction <maximumf>, %8, %cst_10 [1] : vector<1x128xf32> to vector<1xf32>
    %12 = vector.shape_cast %11 : vector<1xf32> to vector<1x1xf32>
    %13 = arith.maximumf %10, %12 : vector<1x1xf32>
    %c0_11 = arith.constant 0 : index
    %c0_12 = arith.constant 0 : index
    %14 = vector.load %arg10[%c0_11, %c0_12] : memref<1x1xf32, #tpu.memory_space<vmem>>, vector<1x1xf32>
    %15 = arith.subf %10, %13 : vector<1x1xf32>
    %16 = math.exp %15 : vector<1x1xf32>
    %17 = arith.mulf %14, %16 : vector<1x1xf32>
    %18 = vector.broadcast %13 : vector<1x1xf32> to vector<1x128xf32>
    %19 = arith.subf %8, %18 : vector<1x128xf32>
    %20 = math.exp %19 : vector<1x128xf32>
    %cst_13 = arith.constant dense<0.000000e+00> : vector<1xf32>
    %21 = vector.multi_reduction <add>, %20, %cst_13 [1] : vector<1x128xf32> to vector<1xf32>
    %22 = vector.shape_cast %21 : vector<1xf32> to vector<1x1xf32>
    %23 = arith.addf %17, %22 : vector<1x1xf32>
    %c0_14 = arith.constant 0 : index
    %c0_15 = arith.constant 0 : index
    %24 = vector.load %arg10[%c0_14, %c0_15] : memref<1x1xf32, #tpu.memory_space<vmem>>, vector<1x1xf32>
    tpu.vector_store %arg10[%c0_14, %c0_15], %23 {strides = array<i32>} : memref<1x1xf32, #tpu.memory_space<vmem>>, vector<1x1xf32>,
    %c0_16 = arith.constant 0 : index
    %c0_17 = arith.constant 0 : index
    %25 = vector.load %arg9[%c0_16, %c0_17] : memref<1x1xf32, #tpu.memory_space<vmem>>, vector<1x1xf32>
    tpu.vector_store %arg9[%c0_16, %c0_17], %13 {strides = array<i32>} : memref<1x1xf32, #tpu.memory_space<vmem>>, vector<1x1xf32>,
    %c3_i32 = arith.constant 3 : i32
    %26 = arith.cmpi eq, %arg0, %c3_i32 : i32
    %27 = arith.extui %26 : i1 to i32
    %c0_i32_18 = arith.constant 0 : i32
    %28 = arith.cmpi ne, %27, %c0_i32_18 : i32
    scf.if %28 {
      %c0_19 = arith.constant 0 : index
      %c0_20 = arith.constant 0 : index
      %29 = vector.load %arg9[%c0_19, %c0_20] : memref<1x1xf32, #tpu.memory_space<vmem>>, vector<1x1xf32>
      %c0_21 = arith.constant 0 : index
      %c0_22 = arith.constant 0 : index
      %30 = vector.load %arg10[%c0_21, %c0_22] : memref<1x1xf32, #tpu.memory_space<vmem>>, vector<1x1xf32>
      %31 = math.log %30 : vector<1x1xf32>
      %32 = arith.addf %29, %31 : vector<1x1xf32>
      %c0_23 = arith.constant 0 : index
      %c0_24 = arith.constant 0 : index
      %33 = vector.load %arg6[%c0_23, %c0_24] : memref<1x1xf32, #tpu.memory_space<vmem>>, vector<1x1xf32>
      tpu.vector_store %arg6[%c0_23, %c0_24], %32 {strides = array<i32>} : memref<1x1xf32, #tpu.memory_space<vmem>>, vector<1x1xf32>,
    } else {
    }
    return
  }
  func.func @transform_0(%arg0: i32) -> i32 {
    %c0_i32 = arith.constant 0 : i32
    %c0_i32_0 = arith.constant 0 : i32
    return %c0_i32 : i32
  }
  func.func @transform_2(%arg0: i32) -> (i32, i32) {
    %c0_i32 = arith.constant 0 : i32
    %c0_i32_0 = arith.constant 0 : i32
    return %arg0, %c0_i32 : i32, i32
  }
  func.func @transform_3(%arg0: i32) -> (i32, i32) {
    %c0_i32 = arith.constant 0 : i32
    %c0_i32_0 = arith.constant 0 : i32
    return %c0_i32, %arg0 : i32, i32
  }
  func.func @transform_4(%arg0: i32) -> (i32, i32) {
    %c0_i32 = arith.constant 0 : i32
    %c0_i32_0 = arith.constant 0 : i32
    return %c0_i32, %arg0 : i32, i32
  }
  func.func @transform_5(%arg0: i32) -> (i32, i32) {
    %c0_i32 = arith.constant 0 : i32
    %c0_i32_0 = arith.constant 0 : i32
    %c0_i32_1 = arith.constant 0 : i32
    return %c0_i32, %c0_i32_0 : i32, i32
  }
}

</mosaic_0001>

<bundles_post_ra>
// kernel: tpu_custom_call.1
= control target key start
LH: loop header
LB: loop body
LE: loop exit
PB: predicated region body
PF: predicated region fallthrough
CT: control target
= control target key end

     0   :  { %11 = vsyncpa [#allocation9], 0  ;;  %s1751_s0 = inlined_call_operand.vmem [shape: s32[8], index: 0, kind: input, shape index: {}]   ;;  %s1752_s1 = inlined_call_operand.vmem [shape: f32[500,32], index: 1, kind: input, shape index: {}]   ;;  %s1753_s2 = inlined_call_operand.vmem [shape: bf16[512,32], index: 2, kind: input, shape index: {}]   ;;  %s1754_s3 = inlined_call_operand.vmem [shape: f32[1,512], index: 3, kind: input, shape index: {}]   ;;  %s1755_s4 = inlined_call_operand.hbm [shape: f32[1,512], index: 4, kind: output, shape index: {0}]   ;;  %s1756_s5 = inlined_call_operand.hbm [shape: f32[1,1], index: 5, kind: output, shape index: {1}]  }
   0x1   :  { %12 = vsyncpa [#allocation8], 0 }
   0x2   :  { %14 = vsyncpa [#allocation8 + $0x1], 0 }
   0x3   :  { %15 = vsyncpa [#allocation12], 0  ;;  %s1516_s18 = smov 0   ;;  %s1518_s19 = smov 0  }
   0x4   :  { %s1520_s20 = smov 0   ;;  %s1522_s21 = smov 0  }
   0x5 LB: > { %s1537_s22 = sadd.s32 4294967295, %s1475_s21   ;;  %s1108_s23 = sadd.s32 4294967294, %s1475_s21   ;;  %s1475_s21 = sphi %s1522_s21, %s1774_s21   ;;  %s1471_s20 = sphi %s1520_s20, %s1773_s20   ;;  %s1467_s19 = sphi %s1518_s19, %s1772_s19   ;;  %s1463_s18 = sphi %s1516_s18, %s1771_s18  }
   0x6   : > { %s1541_s24 = sadd.s32 1, %s1475_s21   ;;  %s101_s25 = sadd.s32 1, %s1471_s20 }
   0x7   : > { %s98_s26 = ssub.s32 %s1475_s21, %s1541_s24  ;;  %p111_p0 = scmp.ne.s32.totalorder %s1471_s20, %s1467_s19 }
   0x8   : > { %p99_p1 = scmp.eq.s32.totalorder %s98_s26, 0  ;;  %p1757_p2 = scmp.eq.s32.totalorder %s1537_s22, 3 }
   0x9   : > { %p117_p3 = scmp.ne.s32.totalorder %s1467_s19, %s1463_s18  ;;  %p118_p4 = scmp.eq.s32.totalorder %s1108_s23, 3 }
   0xa   : > { %s1552_s27 = scalar_select %p99_p1, %s1471_s20, %s101_s25  }
   0xb   : > { %p1556_p5 = por %p1757_p2, %p111_p0  ;;  %p1560_p6 = por %p118_p4, %p117_p3 }
   0xc   : > { %p1109_p7 = scmp.ge.s32.totalorder %s1475_s21, 1  ;;  %p146_p8 = scmp.lt.s32.totalorder %s1475_s21, 5 }
   0xd   : > { %p1296_p10 = scmp.eq.s32.totalorder %s1537_s22, 0  ;;  %s159_s8 = sshll.u32 %s1751_s0, 4  ;;  %s160_s8 = int_to_ptr.vmem [resolvable:$true] %s159_s8 }
   0xe   : > { %p1568_p11 = pnand %p1109_p7, %p146_p8  ;;  %s1348_s9 = scalar_lea.vmem %s160_s8, 16 }
   0xf   : > { %p1349_p0 = scmp.ne.s32.totalorder %s160_s8, %s1348_s9  ;;  %p1356_p2 = scmp.lt.s32.totalorder %s160_s8, %s160_s8 }
  0x10   : > { %p1288_p12 = pneg %p1568_p11  ;;  %p1357_p7 = scmp.lt.s32.totalorder %s1348_s9, %s1348_s9 }
  0x12   : > { %p1289_p13 = pnand %p1296_p10, %p1288_p12  ;;  %p1358_p8 = por %p1357_p7, %p1356_p2 }
  0x14   : > { %p1350_p1 = pneg %p1289_p13 }
  0x16   : > { %p1351_p3 = pnand %p1350_p1, %p1349_p0 }
  0x18   : > { %p1352_p4 = pneg %p1351_p3 }
  0x1a   : > { %p1359_p9 = pnand %p1358_p8, %p1352_p4 }
  0x1c   : > { %1362 = shalt.err (!%p1359_p9)
}
  0x1d   : > { %s1477_s10 = smov [#allocation7]   ;;  %187 = sbr.rel (%p1568_p11) target bundleno = 937 (0x3a9), region = 32 }
  0x1e   : > { %1291 = dma.vmem_to_smem (!%p1289_p13), %s160_s8, 16, %s1477_s10, [#allocation9]  }
  0x24   : > { %1434 = dma.done.wait (%p1296_p10), [#allocation9], 16  }
  0x25   : > { %1436 = vsyncadd (%p1296_p10), [#allocation9], 4294967280 }
  0x26   : > { %193 = sfence }
  0x27   : > { %s1758_s11 = sand.u32 1, %s1467_s19   ;;  %s1587_s12 = sshll.u32 %s1537_s22, 4 }
  0x28   : > { %p217_p2 = scmp.lt.s32.totalorder %s1587_s12, 63  ;;  %p222_p9 = scmp.lt.s32.totalorder %s1537_s22, 3 }
  0x29   : > { %s1606_s6 = scalar_lea.vmem [#allocation10], %s1758_s11  ;;  %p1762_p10 = scmp.ne.s32.totalorder %s1537_s22, 0 }
  0x2a   : > { %s218_s13 = scalar_select %p217_p2, %s1587_s12, 63 }
  0x2b   : > { %s1593_s14 = scalar_select %p222_p9, %s1537_s22, 3 }
  0x2c   : > { %s1115_s15 = sshll.u32 %s218_s13, 2  ;;  %228 = sbr.rel (%p1762_p10) target bundleno = 149 (0x95), region = 40 }
  0x2d   : > { %s1598_s23 = scalar_lea.vmem %s1753_s2, %s1115_s15  ;;  %s229_s7 = sld [smem:[#allocation7]] (!%p1762_p10) }
  0x33   : > { %s230_s10 = scalar_lea.vmem %s1752_s1, %s229_s7 }
  0x34   : > { %v248_v0 = vld [vmem:[%s230_s10] sm:$0x1] }
  0x35   : > { %249 = vst [vmem:[#allocation2] sm:$0x1] %v248_v0 }
  0x36   : > { %274 = vsyncadd [#allocation6], 16  ;;  %s1117_s13 = sld [smem:[#allocation7 + $0x1]] }
  0x3c   : > { %s276_s17 = scalar_lea.vmem %s1752_s1, %s1117_s13 }
  0x3d   : > { %v296_v1 = vld [vmem:[%s276_s17] sm:$0x1] }
  0x3e   : > { %297 = vst [vmem:[#allocation2 + $0x1] sm:$0x1] %v296_v1 }
  0x3f   : > { %322 = vsyncadd [#allocation6 + $0x1], 16  ;;  %s1118_s25 = sld [smem:[#allocation7 + $0x2]] }
  0x45   : > { %s324_s30 = scalar_lea.vmem %s1752_s1, %s1118_s25 }
  0x46   : > { %v344_v2 = vld [vmem:[%s324_s30] sm:$0x1] }
  0x47   : > { %345 = vst [vmem:[#allocation2 + $0x2] sm:$0x1] %v344_v2 }
  0x48   : > { %370 = vsyncadd [#allocation6 + $0x2], 16  ;;  %s1119_s7 = sld [smem:[#allocation7 + $0x3]] }
  0x4e   : > { %s372_s10 = scalar_lea.vmem %s1752_s1, %s1119_s7 }
  0x4f   : > { %v392_v3 = vld [vmem:[%s372_s10] sm:$0x1] }
  0x50   : > { %393 = vst [vmem:[#allocation2 + $0x3] sm:$0x1] %v392_v3 }
  0x51   : > { %418 = vsyncadd [#allocation6 + $0x3], 16  ;;  %s1120_s13 = sld [smem:[#allocation7 + $0x4]] }
  0x57   : > { %s420_s17 = scalar_lea.vmem %s1752_s1, %s1120_s13 }
  0x58   : > { %v440_v4 = vld [vmem:[%s420_s17] sm:$0x1] }
  0x59   : > { %441 = vst [vmem:[#allocation2 + $0x4] sm:$0x1] %v440_v4 }
  0x5a   : > { %466 = vsyncadd [#allocation6 + $0x4], 16  ;;  %s1121_s11 = sld [smem:[#allocation7 + $0x5]] }
  0x60   : > { %s468_s26 = scalar_lea.vmem %s1752_s1, %s1121_s11 }
  0x61   : > { %v488_v5 = vld [vmem:[%s468_s26] sm:$0x1] }
  0x62   : > { %489 = vst [vmem:[#allocation2 + $0x5] sm:$0x1] %v488_v5 }
  0x63   : > { %514 = vsyncadd [#allocation6 + $0x5], 16  ;;  %s1122_s7 = sld [smem:[#allocation7 + $0x6]] }
  0x69   : > { %s516_s10 = scalar_lea.vmem %s1752_s1, %s1122_s7 }
  0x6a   : > { %v536_v6 = vld [vmem:[%s516_s10] sm:$0x1] }
  0x6b   : > { %537 = vst [vmem:[#allocation2 + $0x6] sm:$0x1] %v536_v6 }
  0x6c   : > { %562 = vsyncadd [#allocation6 + $0x6], 16  ;;  %s1123_s13 = sld [smem:[#allocation7 + $0x7]] }
  0x72   : > { %s564_s17 = scalar_lea.vmem %s1752_s1, %s1123_s13 }
  0x73   : > { %v584_v7 = vld [vmem:[%s564_s17] sm:$0x1] }
  0x74   : > { %585 = vst [vmem:[#allocation2 + $0x7] sm:$0x1] %v584_v7 }
  0x75   : > { %610 = vsyncadd [#allocation6 + $0x7], 16 }
  0x76   : > { %1437 = dma.done.wait [#allocation6], 16 }
  0x77   : > { %1438 = vsyncadd [#allocation6], 4294967280 }
  0x78   : > { %1439 = dma.done.wait [#allocation6 + $0x1], 16 }
  0x79   : > { %1440 = vsyncadd [#allocation6 + $0x1], 4294967280 }
  0x7a   : > { %1441 = dma.done.wait [#allocation6 + $0x2], 16 }
  0x7b   : > { %1442 = vsyncadd [#allocation6 + $0x2], 4294967280 }
  0x7c   : > { %1443 = dma.done.wait [#allocation6 + $0x3], 16 }
  0x7d   : > { %1444 = vsyncadd [#allocation6 + $0x3], 4294967280 }
  0x7e   : > { %1445 = dma.done.wait [#allocation6 + $0x4], 16 }
  0x7f   : > { %1446 = vsyncadd [#allocation6 + $0x4], 4294967280 }
  0x80   : > { %1447 = dma.done.wait [#allocation6 + $0x5], 16 }
  0x81   : > { %1448 = vsyncadd [#allocation6 + $0x5], 4294967280 }
  0x82   : > { %1449 = dma.done.wait [#allocation6 + $0x6], 16 }
  0x83   : > { %1450 = vsyncadd [#allocation6 + $0x6], 4294967280 }
  0x84   : > { %1451 = dma.done.wait [#allocation6 + $0x7], 16 }
  0x85   : > { %1452 = vsyncadd [#allocation6 + $0x7], 4294967280  ;;  %vm647_vm0 = vcmask 0   ;;  %v1478_v8 = vmov -inf   ;;  %v1479_v9 = vmov 0.0   ;;  %vm637_vm1 = vcmask 261120  }
  0x86   : > { %648 = vst.msk [vmem:[#allocation4] sm:$0x1] %vm647_vm0, %v1478_v8  ;;  %649 = vst.msk [vmem:[#allocation5] sm:$0x1] %vm647_vm0, %v1479_v9  ;;  %v636_v10 = vld [vmem:[#allocation2] sm:$0xff]  ;;  %vm645_vm2 = vcmask 253952  }
  0x87   : > { %v638_v11 = vsel %vm637_vm1, %v636_v10, 0.0 }
  0x88   : > { %v639_v12 = vrot.slane %v638_v11, 4 }
  0x8a   : > { %v640_v13 = vadd.f32 %v639_v12, %v638_v11 }
  0x8c   : > { %v641_v14 = vrot.slane %v640_v13, 2 }
  0x8e   : > { %v642_v15 = vadd.f32 %v641_v14, %v640_v13 }
  0x90   : > { %v643_v16 = vrot.slane %v642_v15, 1 }
  0x92   : > { %v644_v17 = vadd.f32 %v643_v16, %v642_v15 }
  0x94   : > { %646 = vst.msk [vmem:[#allocation3] sm:$0x1] %vm645_vm2, %v644_v17 }
  0x95 PF: > { %v1156_v18 = vld [vmem:[%s1598_s23] sm:$0xff]   ;;  %vm684_vm3 = vcmask 261120   ;;  %v1480_v19 = vmov 0.0|0.0   ;;  %vm1481_vm5 = vmmov 0   ;;  %v1482_v21 = vmov 0.0   ;;  %v1187_v22 = vld [vmem:[%s1598_s23 + $0x8] sm:$0xff]   ;;  %s1765_s25 = scalar_lea.vmem %s1754_s3, %s1593_s14 }
  0x96   : > { %1246 = vmatprep.subr.bf16.mxu0 %v1480_v19  ;;  %vm1637_vm4 = vmpackc.low %vm684_vm3, %vm684_vm3  ;;  %1243 = vmatprep.mubr.msk.f32.mxu0 %vm1481_vm5, %v1482_v21  ;;  %v1188_v23 = vld [vmem:[%s1598_s23 + $0x10] sm:$0xff]   ;;  %v1189_v24 = vld [vmem:[%s1598_s23 + $0x18] sm:$0xff]   ;;  %vm808_vm6 = vcmask 1040384   ;;  %v1483_v35 = vmov 0   ;;  %vm834_vm7 = vcmask 0   ;;  %v823_v40 = vlaneseq  ;;  %p1141_p11 = scmp.ne.s32.totalorder %s1537_s22, 3 }
  0x97   : > { %1249 = vmatpush3.bf16.xpose.msk.msra.mxu0 %vm1637_vm4, %v1156_v18  ;;  %v1190_v25 = vld [vmem:[%s1598_s23 + $0x20] sm:$0xff]   ;;  %v1191_v26 = vld [vmem:[%s1598_s23 + $0x28] sm:$0xff]   ;;  %v1192_v27 = vld [vmem:[%s1598_s23 + $0x30] sm:$0xff]   ;;  %1341 = vset.pattern.permute.xlu0 %v1483_v35 }
  0x98   : > { %1250 = vmatprep.subr.bf16.mxu0 %v1480_v19  ;;  %v1193_v28 = vld [vmem:[%s1598_s23 + $0x38] sm:$0xff]   ;;  %v683_v30 = vld [vmem:[%s1765_s25] sm:$0x1]  ;;  %v807_v36 = vld [vmem:[#allocation4] sm:$0x1]  ;;  %v824_v41 = vshrl.u32 %v823_v40, 7 }
  0x99   : > { %v813_v51 = vld [vmem:[#allocation5] sm:$0x1] }
  0x9a   : > { %v825_v42 = vsub.s32 0, %v824_v41 }
  0x9b   : > { %v682_v29 = vld [vmem:[#allocation3] sm:$0x1] }
  0x9f   : > { %1253 = vmatpush3.bf16.xpose.msk.msra.mxu0 %vm1637_vm4, %v1187_v22 }
  0xa0   : > { %1254 = vmatprep.subr.bf16.mxu0 %v1480_v19 }
  0xa7   : > { %1257 = vmatpush3.bf16.xpose.msk.msra.mxu0 %vm1637_vm4, %v1188_v23 }
  0xa8   : > { %1258 = vmatprep.subr.bf16.mxu0 %v1480_v19 }
  0xaf   : > { %1261 = vmatpush3.bf16.xpose.msk.msra.mxu0 %vm1637_vm4, %v1189_v24 }
  0xb0   : > { %1262 = vmatprep.subr.bf16.mxu0 %v1480_v19 }
  0xb7   : > { %1265 = vmatpush3.bf16.xpose.msk.msra.mxu0 %vm1637_vm4, %v1190_v25 }
  0xb8   : > { %1266 = vmatprep.subr.bf16.mxu0 %v1480_v19 }
  0xbf   : > { %1269 = vmatpush3.bf16.xpose.msk.msra.mxu0 %vm1637_vm4, %v1191_v26 }
  0xc0   : > { %1270 = vmatprep.subr.bf16.mxu0 %v1480_v19 }
  0xc7   : > { %1273 = vmatpush3.bf16.xpose.msk.msra.mxu0 %vm1637_vm4, %v1192_v27 }
  0xc8   : > { %1274 = vmatprep.subr.bf16.mxu0 %v1480_v19 }
  0xcf   : > { %1277 = vmatpush3.bf16.xpose.msk.msra.mxu0 %vm1637_vm4, %v1193_v28 }
  0xd6   : > { %1244 = vmatmul.mubr.msk.f32.vlgmr.msra.gmra.mrb[0].mxu0 %vm684_vm3, %v682_v29 }
 0x1a9   : > { %v802_v31 = vpop.f32.mrb[0].mxu0 }
 0x1aa   : > { %v803_v32 = vadd.f32 %v802_v31, %v683_v30  ;;  %v1245_v33 = vpop.f32.mrb[1].mxu0 }
 0x1ac   : > { %806 = vst [vmem:[%s1606_s6] sm:$0x1] %v803_v32  ;;  %v809_v34 = vsel %vm808_vm6, %v803_v32, -inf }
 0x1ad   : > { %810 = vmax.xlane.f32.xlu0 %v809_v34 }
 0x23a   : > { %v811_v37 = vpop.xlane.xlu0 %810 }
 0x23b   : > { %v812_v38 = vmax.f32 %v807_v36, %v811_v37 }
 0x23d   : > { %v814_v39 = vsub.f32 %v807_v36, %v812_v38  ;;  %836 = vst.msk [vmem:[#allocation4] sm:$0x1] %vm834_vm7, %v812_v38  ;;  %820 = vperm.xlu0 %1341, %v812_v38  }
 0x23f   : > { %v815_v49 = vmul.f32 1.442695, %v814_v39 }
 0x244   : > { %v841_v57 = vld [vmem:[#allocation4] sm:$0x1] (!%p1141_p11) }
 0x2bc   : > { %v821_v43 = vpop.permute.xlu0 %820 }
 0x2bd   : > { %v826_v44 = vrot.slane %v821_v43, %v825_v42 }
 0x2bf   : > { %v827_v45 = vsub.f32 %v803_v32, %v826_v44 }
 0x2c1   : > { %v828_v46 = vmul.f32 1.442695, %v827_v45 }
 0x2c3   : > { %1342 = vpow2.f32 %v828_v46 }
 0x2c4   : > { %1344 = vpow2.f32 %v815_v49 }
 0x2cd   : > { %v1343_v47 = vpop.eup %1342 }
 0x2ce   : > { %v830_v48 = vsel %vm808_vm6, %v1343_v47, 0.0  ;;  %v1345_v50 = vpop.eup %1344 }
 0x2cf   : > { %831 = vadd.xlane.f32.xlu1 %v830_v48  ;;  %v817_v52 = vmul.f32 %v1345_v50, %v813_v51 }
 0x359   : > { %840 = sbr.rel (%p1141_p11) target bundleno = 887 (0x377), region = 284 }
 0x35c   : > { %v832_v53 = vpop.xlane.xlu1 %831 }
 0x35d   : > { %v833_v54 = vadd.f32 %v832_v53, %v817_v52 }
 0x35f   : > { %835 = vst.msk [vmem:[#allocation5] sm:$0x1] %vm834_vm7, %v833_v54 }
 0x366   : > { %v842_v55 = vld [vmem:[#allocation5] sm:$0x1] }
 0x367   : > { %1346 = vlog2.f32 %v842_v55 }
 0x371   : > { %v1347_v56 = vpop.eup %1346 }
 0x372   : > { %v844_v58 = vmul.f32 0.6931472, %v1347_v56 }
 0x374   : > { %v845_v59 = vadd.f32 %v844_v58, %v841_v57 }
 0x376   : > { %846 = vst.msk [vmem:[#allocation11] sm:$0x1] %vm834_vm7, %v845_v59 }
 0x377 PF: > { %s1681_s26 = scalar_lea.hbm %s1755_s4, %s1587_s12  ;;  %s860_s7 = sshll.u32 %s1606_s6, 4  ;;  %s1684_s7 = int_to_ptr.vmem [resolvable:$true] %s860_s7 }
 0x378   : > { %s1484_s8 = smov [#allocation11]   ;;  %s1766_s10 = sand.u32 1, %s1467_s19  }
 0x379   : > { %s1686_s9 = sshll.u32 %s1484_s8, 4  ;;  %s848_s13 = scalar_lea.sflag [#allocation8], %s1766_s10  ;;  %s872_s9 = int_to_ptr.vmem [resolvable:$true] %s1686_s9 }
 0x37a   : > { %s1363_s15 = scalar_lea.vmem %s1684_s7, 16  ;;  %s1485_s16 = smov [#allocation10]  }
 0x37b   : > { %p1364_p12 = scmp.ne.s32.totalorder %s1684_s7, %s1363_s15  ;;  %s1367_s17 = sshll.u32 %s1485_s16, 4  ;;  %s1368_s17 = int_to_ptr.vmem [resolvable:$false] %s1367_s17 }
 0x37c   : > { %s1369_s12 = scalar_lea.vmem %s1368_s17, 32  ;;  %p1370_p1 = scmp.lt.s32.totalorder %s1684_s7, %s1368_s17 }
 0x37d   : > { %p1365_p13 = pnand %p1364_p12, %p1556_p5  ;;  %p1371_p3 = scmp.lt.s32.totalorder %s1369_s12, %s1363_s15 }
 0x37f   : > { %p1366_p0 = pneg %p1365_p13  ;;  %p1372_p4 = por %p1371_p3, %p1370_p1 }
 0x381   : > { %p1373_p7 = pnand %p1372_p4, %p1366_p0 }
 0x383   : > { %1376 = shalt.err (!%p1373_p7)
}
 0x384   : > { %s1377_s6 = scalar_lea.hbm %s1681_s26, 16  ;;  %s1381_s25 = scalar_lea.hbm %s1755_s4, 64 }
 0x385   : > { %p1378_p8 = scmp.ne.s32.totalorder %s1681_s26, %s1377_s6  ;;  %p1382_p10 = scmp.lt.u32.totalorder %s1681_s26, %s1755_s4 }
 0x386   : > { %p1383_p11 = scmp.lt.u32.totalorder %s1381_s25, %s1377_s6  ;;  %p1385_p13 = scmp.lt.u32.totalorder %s1377_s6, %s1681_s26 }
 0x387   : > { %p1379_p2 = pnand %p1378_p8, %p1556_p5 }
 0x388   : > { %p1384_p12 = por %p1383_p11, %p1382_p10 }
 0x389   : > { %p1380_p9 = pneg %p1379_p2 }
 0x38a   : > { %p1386_p0 = por %p1385_p13, %p1384_p12 }
 0x38c   : > { %p1387_p1 = pnand %p1386_p0, %p1380_p9 }
 0x38e   : > { %1390 = shalt.err (!%p1387_p1)
}
 0x38f   : > { %1282 = dma.vmem_to_hbm [thread:$0]  (%p1556_p5), %s1684_s7, 16, %s1681_s26, %s848_s13  }
 0x390   : > { %s1391_s8 = scalar_lea.vmem %s872_s9, 16  ;;  %p1767_p4 = scmp.eq.s32.totalorder %s1537_s22, 3 }
 0x391   : > { %p1392_p3 = scmp.ne.s32.totalorder %s872_s9, %s1391_s8  ;;  %s1397_s10 = scalar_lea.vmem %s872_s9, 32 }
 0x392   : > { %p1398_p2 = scmp.lt.s32.totalorder %s872_s9, %s872_s9  ;;  %p1399_p10 = scmp.lt.s32.totalorder %s1397_s10, %s1391_s8 }
 0x393   : > { %p1393_p7 = pnand %p1392_p3, %p1767_p4 }
 0x394   : > { %p1400_p11 = por %p1399_p10, %p1398_p2 }
 0x395   : > { %p1394_p8 = pneg %p1393_p7 }
 0x397   : > { %p1401_p12 = pnand %p1400_p11, %p1394_p8 }
 0x399   : > { %1404 = shalt.err (!%p1401_p12)
}
 0x39a   : > { %s1405_s28 = scalar_lea.hbm %s1756_s5, 16  ;;  %p1768_p9 = pmov %p1767_p4 }
 0x39b   : > { %p1406_p5 = scmp.ne.s32.totalorder %s1756_s5, %s1405_s28  ;;  %p1411_p1 = scmp.lt.u32.totalorder %s1405_s28, %s1756_s5 }
 0x39d   : > { %p1407_p13 = pnand %p1406_p5, %p1768_p9 }
 0x39f   : > { %p1408_p0 = pneg %p1407_p13 }
 0x3a1   : > { %p1413_p3 = pnand %p1411_p1, %p1408_p0 }
 0x3a3   : > { %1416 = shalt.err (!%p1413_p3)
}
 0x3a4   : > { %1284 = dma.vmem_to_hbm [thread:$0]  (%p1767_p4), %s872_s9, 16, %s1756_s5, [#allocation12]  }
 0x3a5   : > { %p1769_p7 = pmov %p1767_p4 }
 0x3a6   : > { %p1770_p8 = pmov %p1767_p4 }
 0x3a7   : > { %1454 = dma.done.wait (%p1769_p7), [#allocation12], 16  }
 0x3a8   : > { %1456 = vsyncadd (%p1770_p8), [#allocation12], 4294967280 }
 0x3a9 PF: > { %p1300_p2 = scmp.ge.s32.totalorder %s1475_s21, 2  ;;  %s887_s11 = sand.u32 1, %s1463_s18  }
 0x3aa   : > { %s888_s30 = scalar_lea.sflag [#allocation8], %s887_s11 }
 0x3ab   : > { %p1293_p10 = pnand %p1300_p2, %p1560_p6 }
 0x3ad   : > { %1458 = dma.done.wait (!%p1293_p10), %s888_s30, 16  }
 0x3ae   : > { %1460 = vsyncadd (!%p1293_p10), %s888_s30, 4294967280  ;;  %p18_p11 = scmp.ge.s32.totalorder %s1541_s24, 6   ;;  %s1771_s18 = smov %s1467_s19 }
 0x3af   : > { %s1772_s19 = smov %s1471_s20  ;;  %s1773_s20 = smov %s1552_s27 }
 0x3b0   : > { %s1774_s21 = smov %s1541_s24  ;;  %20 = sbr.rel (!%p18_p11) target bundleno = 5 (0x5), region = 440 }
 0x3b7   :  { %892 = vsyncpa [#allocation8], 1 }
 0x3b8   :  { %894 = vsyncpa [#allocation8 + $0x1], 1 }
 0x3b9   :  { %895 = vsyncpa [#allocation12], 1 }
 0x3ba   :  { %896 = vsyncpa [#allocation9], 1 }
 0x3bb   :  { %898 = vsyncpa [#allocation9 + $0x1], 1 }
 0x3bc   :  { %899 = vsyncmov [#allocation6] }
 0x3bf   :  { %s900_s21 = vpop.sfrf %899 }
 0x3c0   :  { %p1147_p6 = scmp.ne.s32.totalorder %s900_s21, 0 }
 0x3c2   :  { %904 = shalt.err (%p1147_p6)  }
 0x3c3   :  { %906 = vsyncmov [#allocation6 + $0x1] }
 0x3c6   :  { %s907_s22 = vpop.sfrf %906 }
 0x3c7   :  { %p1148_p12 = scmp.ne.s32.totalorder %s907_s22, 0 }
 0x3c9   :  { %911 = shalt.err (%p1148_p12)  }
 0x3ca   :  { %913 = vsyncmov [#allocation6 + $0x2] }
 0x3cd   :  { %s914_s29 = vpop.sfrf %913 }
 0x3ce   :  { %p1149_p5 = scmp.ne.s32.totalorder %s914_s29, 0 }
 0x3d0   :  { %918 = shalt.err (%p1149_p5)  }
 0x3d1   :  { %920 = vsyncmov [#allocation6 + $0x3] }
 0x3d4   :  { %s921_s24 = vpop.sfrf %920 }
 0x3d5   :  { %p1150_p9 = scmp.ne.s32.totalorder %s921_s24, 0 }
 0x3d7   :  { %925 = shalt.err (%p1150_p9)  }
 0x3d8   :  { %927 = vsyncmov [#allocation6 + $0x4] }
 0x3db   :  { %s928_s0 = vpop.sfrf %927 }
 0x3dc   :  { %p1151_p13 = scmp.ne.s32.totalorder %s928_s0, 0 }
 0x3de   :  { %932 = shalt.err (%p1151_p13)  }
 0x3df   :  { %934 = vsyncmov [#allocation6 + $0x5] }
 0x3e2   :  { %s935_s1 = vpop.sfrf %934 }
 0x3e3   :  { %p1152_p0 = scmp.ne.s32.totalorder %s935_s1, 0 }
 0x3e5   :  { %939 = shalt.err (%p1152_p0)  }
 0x3e6   :  { %941 = vsyncmov [#allocation6 + $0x6] }
 0x3e9   :  { %s942_s2 = vpop.sfrf %941 }
 0x3ea   :  { %p1153_p1 = scmp.ne.s32.totalorder %s942_s2, 0 }
 0x3ec   :  { %946 = shalt.err (%p1153_p1)  }
 0x3ed   :  { %948 = vsyncmov [#allocation6 + $0x7] }
 0x3f0   :  { %s949_s3 = vpop.sfrf %948 }
 0x3f1   :  { %p1154_p3 = scmp.ne.s32.totalorder %s949_s3, 0 }
 0x3f3   :  { %953 = shalt.err (%p1154_p3)  }

</bundles_post_ra>
